<compile_context>
chip_gen: v5e
topology: v5e:2x2
jax: 0.10.0
libtpu: 0.0.40
codegen_flags: <defaults>
</compile_context>

<pallas_src>
import functools

import jax
import jax.numpy as jnp
from jax import lax
from jax.experimental import pallas as pl
from jax.experimental.pallas import tpu as pltpu


def _ce_label_smooth_kernel(labels_ref, logits_ref, out_ref, *,
                            epsilon, num_classes, batch, block_b):
    # labels_ref: (TB, 1) int32 VMEM
    # logits_ref: (TB, C)  VMEM (native input dtype)
    # out_ref:    (TB, 1)  f32 VMEM  -- per-row loss contributions
    x_nat = logits_ref[...]                                        # (TB, C) native dtype
    labels = labels_ref[...]                                       # (TB, 1) int32

    # row max in native dtype (exact / order preserving), rest in f32
    m = jnp.max(x_nat, axis=1, keepdims=True).astype(jnp.float32)  # (TB, 1)
    z = x_nat.astype(jnp.float32) - m                              # (TB, C) f32
    lse = jnp.log(jnp.sum(jnp.exp(z), axis=1, keepdims=True))      # (TB, 1) f32

    # smoothed-target weights fused into a single lane reduction:
    #   w_c = eps/C + (1-eps) * [c == label]   (sum_c w_c == 1)
    #   row_loss = sum_c w_c * (lse - z_c) = lse - sum_c w_c * z_c
    col = lax.broadcasted_iota(jnp.int32, (1, num_classes), 1)     # (1, C)
    w_on = jnp.float32(1.0 - epsilon + epsilon / num_classes)
    w_off = jnp.float32(epsilon / num_classes)
    w = jnp.where(col == labels, w_on, w_off)                      # (TB, C) via broadcast
    wz = jnp.sum(w * z, axis=1, keepdims=True)                     # (TB, 1)
    row_loss = lse - wz                                            # (TB, 1)

    # Trailing partial batch block: rows >= batch hold garbage (possibly NaN/Inf).
    # Select (not arithmetic) so garbage never propagates; Pallas also discards
    # the out-of-bounds part of the output block on writeback.
    if batch % block_b != 0:
        row0 = pl.program_id(0) * block_b
        rows = row0 + lax.broadcasted_iota(jnp.int32, row_loss.shape, 0)
        row_loss = jnp.where(rows < batch, row_loss, 0.0)

    out_ref[...] = row_loss


def cross_entropy_label_smooth(logits, targets, *, num_classes, epsilon):
    """logits: (B, C) float, targets: (B,) int -> scalar f32 loss."""
    B, C = logits.shape
    assert C == num_classes

    itemsize = jnp.dtype(logits.dtype).itemsize
    c_lanes = ((C + 127) // 128) * 128          # physical lane footprint (VMEM sizing only)

    # Batch tile: multiple of 8 (or the full batch when B <= 8), capped so a
    # full-tile f32 temporary stays ~<= 2 MiB, and sized so the grid has depth
    # (>= 4 steps when possible -> double-buffering + v7x megacore split).
    if B <= 8:
        tb = B
    else:
        tb_cap = max(8, (((2 * 1024 * 1024) // (c_lanes * 4)) // 8) * 8)
        tb_target = ((-(-B // 4) + 7) // 8) * 8   # round8(cdiv(B, 4))
        tb = max(8, min(tb_cap, tb_target))
    num_tiles = pl.cdiv(B, tb)

    labels2d = targets.astype(jnp.int32).reshape(B, 1)

    kernel = functools.partial(
        _ce_label_smooth_kernel,
        epsilon=float(epsilon),
        num_classes=int(num_classes),
        batch=int(B),
        block_b=int(tb),
    )

    # VMEM budget: double-buffered native-dtype input tile + a handful of
    # full-tile f32 temporaries + slack.  Clamp to 32 MiB (fits v7x 64 MiB/TC).
    est = 2 * tb * c_lanes * itemsize + 8 * tb * c_lanes * 4 + (2 << 20)
    vmem_limit = int(min(32 << 20, max(16 << 20, est)))

    row_losses = pl.pallas_call(
        kernel,
        out_shape=jax.ShapeDtypeStruct((B, 1), jnp.float32),
        grid_spec=pltpu.PrefetchScalarGridSpec(
            num_scalar_prefetch=0,
            grid=(num_tiles,),
            in_specs=[
                pl.BlockSpec((tb, 1), lambda i: (i, 0)),   # labels
                pl.BlockSpec((tb, C), lambda i: (i, 0)),   # logits tile (full class dim)
            ],
            out_specs=pl.BlockSpec((tb, 1), lambda i: (i, 0)),  # per-row losses
        ),
        compiler_params=pltpu.CompilerParams(
            dimension_semantics=("parallel",),
            vmem_limit_bytes=vmem_limit,
        ),
    )(labels2d, logits)

    # tiny final reduction + /B in the wrapper keeps the grid axis fully parallel
    return jnp.sum(row_losses) / jnp.float32(B)


def _reference(logits, targets, *, num_classes, epsilon):
    x = logits.astype(jnp.float32)
    logp = x - jax.scipy.special.logsumexp(x, axis=1, keepdims=True)
    t = jax.nn.one_hot(targets, num_classes, dtype=jnp.float32)
    t = (1.0 - epsilon) * t + epsilon / num_classes
    return jnp.sum(jnp.mean(-t * logp, axis=0))


if __name__ == "__main__":
    key = jax.random.PRNGKey(0)
    epsilon = 0.1

    # case 1: lane-aligned, single tile (B=8, C=128)
    # case 2: ragged class axis (C=100) + partial trailing batch block (B=10, tb=8)
    # case 3: bf16 logits, multiple exact tiles (B=16, tb=8)
    cases = [
        (8, 128, jnp.float32, 1e-5),
        (10, 100, jnp.float32, 1e-5),
        (16, 100, jnp.bfloat16, 1e-3),
    ]
    for (B, num_classes, dtype, tol) in cases:
        key, k1, k2 = jax.random.split(key, 3)
        logits = jax.random.normal(k1, (B, num_classes), dtype=jnp.float32).astype(dtype)
        targets = jax.random.randint(k2, (B,), 0, num_classes, dtype=jnp.int32)

        loss = cross_entropy_label_smooth(
            logits, targets, num_classes=num_classes, epsilon=epsilon
        )
        loss = jax.block_until_ready(loss)

        ref = _reference(logits, targets, num_classes=num_classes, epsilon=epsilon)
        assert jnp.allclose(loss, ref, atol=tol, rtol=tol), (B, num_classes, loss, ref)

    print("KERNEL_OK")
</pallas_src>

<mosaic_0001>
module attributes {stable_mosaic.version = 11 : i64} {
  func.func @_ce_label_smooth_kernel(%arg0: i32, %arg1: memref<8x1xi32, #tpu.memory_space<vmem>>, %arg2: memref<8x128xf32, #tpu.memory_space<vmem>>, %arg3: memref<8x1xf32, #tpu.memory_space<vmem>>) attributes {dimension_semantics = [#tpu.dimension_semantics<parallel>], iteration_bounds = array<i64: 1>, scalar_prefetch = 0 : i64, scratch_operands = 0 : i64, tpu.core_type = #tpu.core_type<tc>, window_params = [{transform_indices = @transform_0, window_bounds = array<i64: 8, 1>}, {transform_indices = @transform_1, window_bounds = array<i64: 8, 128>}, {transform_indices = @transform_2, window_bounds = array<i64: 8, 1>}]} {
    %c0 = arith.constant 0 : index
    %c0_0 = arith.constant 0 : index
    %0 = vector.load %arg2[%c0, %c0_0] : memref<8x128xf32, #tpu.memory_space<vmem>>, vector<8x128xf32>
    %c0_1 = arith.constant 0 : index
    %c0_2 = arith.constant 0 : index
    %1 = vector.load %arg1[%c0_1, %c0_2] : memref<8x1xi32, #tpu.memory_space<vmem>>, vector<8x1xi32>
    %cst = arith.constant dense<0xFF800000> : vector<8xf32>
    %2 = vector.multi_reduction <maximumf>, %0, %cst [1] : vector<8x128xf32> to vector<8xf32>
    %3 = vector.shape_cast %2 : vector<8xf32> to vector<8x1xf32>
    %4 = vector.broadcast %3 : vector<8x1xf32> to vector<8x128xf32>
    %5 = arith.subf %0, %4 : vector<8x128xf32>
    %6 = math.exp %5 : vector<8x128xf32>
    %cst_3 = arith.constant dense<0.000000e+00> : vector<8xf32>
    %7 = vector.multi_reduction <add>, %6, %cst_3 [1] : vector<8x128xf32> to vector<8xf32>
    %8 = vector.shape_cast %7 : vector<8xf32> to vector<8x1xf32>
    %9 = math.log %8 : vector<8x1xf32>
    %10 = tpu.iota {dimensions = array<i32: 1>} : vector<1x128xi32>
    %11 = vector.broadcast %10 : vector<1x128xi32> to vector<8x128xi32>
    %12 = vector.broadcast %1 : vector<8x1xi32> to vector<8x128xi32>
    %13 = arith.cmpi eq, %11, %12 : vector<8x128xi32>
    %cst_4 = arith.constant 0.900781273 : f32
    %cst_5 = arith.constant 7.812500e-04 : f32
    %14 = vector.broadcast %cst_4 : f32 to vector<8x128xf32>
    %15 = vector.broadcast %cst_5 : f32 to vector<8x128xf32>
    %16 = arith.select %13, %14, %15 : vector<8x128xi1>, vector<8x128xf32>
    %17 = arith.mulf %16, %5 : vector<8x128xf32>
    %cst_6 = arith.constant dense<0.000000e+00> : vector<8xf32>
    %18 = vector.multi_reduction <add>, %17, %cst_6 [1] : vector<8x128xf32> to vector<8xf32>
    %19 = vector.shape_cast %18 : vector<8xf32> to vector<8x1xf32>
    %20 = arith.subf %9, %19 : vector<8x1xf32>
    %c0_7 = arith.constant 0 : index
    %c0_8 = arith.constant 0 : index
    %21 = vector.load %arg3[%c0_7, %c0_8] : memref<8x1xf32, #tpu.memory_space<vmem>>, vector<8x1xf32>
    tpu.vector_store %arg3[%c0_7, %c0_8], %20 {strides = array<i32>} : memref<8x1xf32, #tpu.memory_space<vmem>>, vector<8x1xf32>,
    return
  }
  func.func @transform_0(%arg0: i32) -> (i32, i32) {
    %c0_i32 = arith.constant 0 : i32
    %c0_i32_0 = arith.constant 0 : i32
    return %arg0, %c0_i32 : i32, i32
  }
  func.func @transform_1(%arg0: i32) -> (i32, i32) {
    %c0_i32 = arith.constant 0 : i32
    %c0_i32_0 = arith.constant 0 : i32
    return %arg0, %c0_i32 : i32, i32
  }
  func.func @transform_2(%arg0: i32) -> (i32, i32) {
    %c0_i32 = arith.constant 0 : i32
    %c0_i32_0 = arith.constant 0 : i32
    return %arg0, %c0_i32 : i32, i32
  }
}

</mosaic_0001>

<bundles_post_ra>
// kernel: tpu_custom_call.1
= control target key start
LH: loop header
LB: loop body
LE: loop exit
PB: predicated region body
PF: predicated region fallthrough
CT: control target
= control target key end

     0   :  { %v46_v1 = vmov 0   ;;  %v22_v7 = vlaneseq  ;;  %v47_v10 = vmov 0.00078125   ;;  %vm33_vm1 = vcmask 7168   ;;  %s72_s1 = inlined_call_operand.vmem [shape: f32[8,128], index: 1, kind: input, shape index: {}]   ;;  %s73_s0 = inlined_call_operand.vmem [shape: s32[8,1], index: 0, kind: input, shape index: {}]   ;;  %s74_s2 = inlined_call_operand.vmem [shape: f32[8,1], index: 2, kind: output, shape index: {}]  }
   0x1   :  { %v11_v0 = vld [vmem:[%s72_s1] sm:$0xff]  ;;  %41 = vset.pattern.permute.xlu0 %v46_v1 }
   0x2   :  { %13 = vmax.xlane.f32.xlu0 %v11_v0  ;;  %v12_v2 = vld [vmem:[%s73_s0] sm:$0xff]  ;;  %v23_v8 = vand.u32 127, %v22_v7 }
  0x16   :  { %25 = vperm.xlu0 %41, %v12_v2  }
  0x75   :  { %v14_v3 = vpop.xlane.xlu0 %13 }
  0x76   :  { %v15_v4 = vsub.f32 %v11_v0, %v14_v3 }
  0x78   :  { %v16_v5 = vmul.f32 1.442695, %v15_v4 }
  0x7a   :  { %42 = vpow2.f32 %v16_v5 }
  0x80   :  { %v43_v6 = vpop.eup %42 }
  0x81   :  { %18 = vadd.xlane.f32.xlu1 %v43_v6 }
  0x88   :  { %v26_v9 = vpop.permute.xlu0 %25 }
  0x89   :  { %vm27_vm0 = vcmp.eq.s32.totalorder %v23_v8, %v26_v9 }
  0x8a   :  { %v28_v11 = vsel %vm27_vm0, 0.9007813, %v47_v10 }
  0x8b   :  { %v29_v12 = vmul.f32 %v28_v11, %v15_v4 }
  0x8d   :  { %30 = vadd.xlane.f32.xlu1 %v29_v12 }
  0xf4   :  { %v19_v13 = vpop.xlane.xlu1 %18 }
  0xf5   :  { %44 = vlog2.f32 %v19_v13 }
  0xfb   :  { %v45_v14 = vpop.eup %44 }
  0xfc   :  { %v21_v15 = vmul.f32 0.6931472, %v45_v14 }
 0x100   :  { %v31_v16 = vpop.xlane.xlu1 %30 }
 0x101   :  { %v32_v17 = vsub.f32 %v21_v15, %v31_v16 }
 0x103   :  { %34 = vst.msk [vmem:[%s74_s2] sm:$0xff] %vm33_vm1, %v32_v17 }

</bundles_post_ra>
